<compile_context>
chip_gen: v7x
topology: tpu7x:2x2x1
jax: 0.10.0
libtpu: 0.0.40
codegen_flags: <defaults>
</compile_context>

<pallas_src>
import jax
import jax.numpy as jnp
from jax.experimental import pallas as pl
from jax.experimental.pallas import tpu as pltpu


def _round_up(x: int, m: int) -> int:
    return ((x + m - 1) // m) * m


# -----------------------------------------------------------------------------
# Path A: small vocabulary -> one-hot matmul against a VMEM-resident table.
# -----------------------------------------------------------------------------
def _embed_onehot_kernel(ids_ref, table_ref, out_ref):
    # ids_ref:   (1, TOK_TILE, 1) int32  -- sublane-major ids (no in-kernel transpose)
    # table_ref: (NO_EMBEDS, EMBED_DIM_P) -- full table, VMEM-resident, single copy
    # out_ref:   (TOK_TILE, EMBED_DIM_P)
    tok_tile = out_ref.shape[0]
    no_embeds = table_ref.shape[0]
    mxu_dtype = table_ref.dtype  # bf16 table -> exact single MXU pass; f32 -> multi-pass

    table = table_ref[...]  # hoisted out of the sub-block loop

    # Chunk the token axis in 128-row sub-blocks so the live one-hot slab stays
    # <= ~16-32 vregs (a 512-row f32 one-hot would otherwise occupy the whole
    # vreg file and spill, serializing with the matmul pushes / output stores).
    for s0 in range(0, tok_tile, 128):
        sub = min(128, tok_tile - s0)  # tok_tile is a multiple of 8, so sub is too
        ids_col = ids_ref[0, pl.ds(s0, sub), :]                          # (sub, 1)
        iota_e = jax.lax.broadcasted_iota(jnp.int32, (sub, no_embeds), 1)
        one_hot = (iota_e == ids_col).astype(mxu_dtype)                  # (sub, no_embeds)
        out_ref[pl.ds(s0, sub), :] = jnp.dot(
            one_hot, table, preferred_element_type=jnp.float32
        ).astype(out_ref.dtype)


def _lookup_onehot(ids_flat, table_p, *, tok_tile):
    (ntok,) = ids_flat.shape
    no_embeds, embed_dim_p = table_p.shape
    itemsize = jnp.dtype(table_p.dtype).itemsize

    # Token tile: multiple of 8 sublanes, sized so the grid has >= 2 steps when
    # possible (v7x megacore), capped at tok_tile to bound the double-buffered
    # output tile in VMEM.
    tile = max(8, min(tok_tile, _round_up(pl.cdiv(ntok, 2), 8)))
    num_tiles = pl.cdiv(ntok, tile)
    ntok_pad = num_tiles * tile

    if ntok_pad != ntok:
        # Padded tokens gather row 0; their rows are sliced off by the caller.
        ids_flat = jnp.pad(ids_flat, (0, ntok_pad - ntok))
    ids3 = ids_flat.reshape(num_tiles, tile, 1)

    # Explicit VMEM budget: 1x table (whole-array VMEM spec => single buffer),
    # 2x ids tile (size-1 lane dim pads to 128 lanes), 2x output tile, plus
    # slack for one-hot vregs / internal scratch.  Capped at v7x's 64 MiB.
    table_bytes = _round_up(no_embeds, 8) * embed_dim_p * itemsize
    ids_bytes = 2 * tile * 128 * 4
    out_bytes = 2 * tile * embed_dim_p * itemsize
    vmem_limit = int(min(64 * 2**20, table_bytes + ids_bytes + out_bytes + 8 * 2**20))

    cost = pl.CostEstimate(
        flops=2 * ntok_pad * no_embeds * embed_dim_p,
        transcendentals=0,
        bytes_accessed=(no_embeds * embed_dim_p * itemsize
                        + ntok_pad * 4
                        + ntok_pad * embed_dim_p * itemsize),
    )

    out = pl.pallas_call(
        _embed_onehot_kernel,
        out_shape=jax.ShapeDtypeStruct((ntok_pad, embed_dim_p), table_p.dtype),
        grid=(num_tiles,),
        in_specs=[
            # per-tile ids
            pl.BlockSpec((1, tile, 1), lambda i: (i, 0, 0)),
            # whole table resident in VMEM for the kernel lifetime (not part of
            # the grid pipeline => single-buffered, 1x footprint)
            pl.BlockSpec(memory_space=pltpu.MemorySpace.VMEM),
        ],
        out_specs=pl.BlockSpec((tile, embed_dim_p), lambda i: (i, 0)),
        compiler_params=pltpu.CompilerParams(
            dimension_semantics=("parallel",),
            vmem_limit_bytes=vmem_limit,
        ),
        cost_estimate=cost,
    )(ids3, table_p)

    return out[:ntok]


# -----------------------------------------------------------------------------
# Path B: large vocabulary -> scalar-prefetch row gather (pure DMA).
# -----------------------------------------------------------------------------
def _embed_row_gather_kernel(ids_ref, row_ref, out_ref):
    # ids_ref: scalar-prefetch SMEM ref (consumed by the index_maps, unused here)
    # row_ref: (1, EMBED_DIM_P) -- table row ids[i], DMA'd in by the BlockSpec
    # out_ref: (1, EMBED_DIM_P)
    del ids_ref
    out_ref[...] = row_ref[...]


def _lookup_row_gather(ids_flat, table_p):
    (ntok,) = ids_flat.shape
    no_embeds, embed_dim_p = table_p.shape
    itemsize = jnp.dtype(table_p.dtype).itemsize

    cost = pl.CostEstimate(
        flops=0,
        transcendentals=0,
        bytes_accessed=ntok * 4 + 2 * ntok * embed_dim_p * itemsize,
    )

    # TODO(synk): batch several gathered rows per grid step (multiple table
    # in_specs or a manual make_async_copy gather) to amortize the ~0.35us
    # per-step overhead; one row per step is correct and already DMA-bound.
    grid_spec = pltpu.PrefetchScalarGridSpec(
        num_scalar_prefetch=1,
        grid=(ntok,),
        in_specs=[pl.BlockSpec((1, embed_dim_p), lambda i, ids: (ids[i], 0))],
        out_specs=pl.BlockSpec((1, embed_dim_p), lambda i, ids: (i, 0)),
    )
    return pl.pallas_call(
        _embed_row_gather_kernel,
        out_shape=jax.ShapeDtypeStruct((ntok, embed_dim_p), table_p.dtype),
        grid_spec=grid_spec,
        compiler_params=pltpu.CompilerParams(
            dimension_semantics=("arbitrary",),
        ),
        cost_estimate=cost,
    )(ids_flat, table_p)


# -----------------------------------------------------------------------------
# Wrapper
# -----------------------------------------------------------------------------
def narr_embedding_lookup(
    ids,
    table,
    *,
    tok_tile=512,
    onehot_vocab_limit=1024,
    onehot_table_bytes_limit=4 * 2**20,
    xla_fallback_below_elems=0,
):
    """Pallas equivalent of nn.Embedding(ids) with a fixed weight table.

    ids:   int (B, S)
    table: (NO_EMBEDS, EMBED_DIM), dtype preserved
    returns (B, S, EMBED_DIM) in table.dtype
    """
    B, S = ids.shape
    no_embeds, embed_dim = table.shape
    ntok = B * S

    ids_flat = ids.reshape(ntok).astype(jnp.int32)
    # PyTorch nn.Embedding raises on out-of-range ids; we clamp so the gather DMA
    # stays in bounds.  TODO(synk): add an explicit host-side range check if ids
    # can ever be out of range.
    ids_flat = jnp.clip(ids_flat, 0, no_embeds - 1)

    # Tiny-input escape hatch: below this many output elements the pallas_call
    # launch + table DMA dominates; let XLA's fused gather handle it.  Disabled
    # by default (0) so this script always exercises the Pallas kernels.
    if ntok * embed_dim < xla_fallback_below_elems:
        return table[ids_flat].reshape(B, S, embed_dim)

    # Lane-align the embedding width so output stores are dense vst (not vst.msk).
    embed_dim_p = _round_up(embed_dim, 128)
    if embed_dim_p != embed_dim:
        table_p = jnp.pad(table, ((0, 0), (0, embed_dim_p - embed_dim)))
    else:
        table_p = table

    itemsize = jnp.dtype(table.dtype).itemsize
    table_bytes = no_embeds * embed_dim_p * itemsize
    use_onehot = (no_embeds <= onehot_vocab_limit
                  and table_bytes <= onehot_table_bytes_limit)

    if use_onehot:
        out = _lookup_onehot(ids_flat, table_p, tok_tile=tok_tile)
    else:
        out = _lookup_row_gather(ids_flat, table_p)

    if embed_dim_p != embed_dim:
        out = out[:, :embed_dim]
    return out.reshape(B, S, embed_dim)


class NarrEmbeddingWrapperPallas:
    """Forward-pass port of NarrEmbeddingWrapper (embedding lookup + base model)."""

    def __init__(self, narration_embeds, padding_idx, base_model=None):
        # PyTorch keeps _weight as given (padding row is NOT zeroed when _weight
        # is supplied); dtype is preserved.
        self.embed_weight = jnp.asarray(narration_embeds)
        self.padding_idx = padding_idx  # forward-pass no-op (gradient-only in PyTorch)
        # TODO(synk): base_model is an arbitrary external nn.Module (epoch hooks,
        # heatmap/classification accessors, etc.); modeled as identity on the dict.
        self.base_model = base_model if base_model is not None else (lambda d: d)

    def __call__(self, x):
        language_f = narr_embedding_lookup(x["language_f"], self.embed_weight)
        x = dict(x)
        x["language_f"] = language_f
        return self.base_model(x)


if __name__ == "__main__":
    key = jax.random.PRNGKey(0)
    k1, k2, k3, k4, k5, k6 = jax.random.split(key, 6)

    batch, seq = 2, 8
    padding_idx = 0

    # --- Path A: small vocab, f32 table (matches torch.Tensor default dtype) ---
    no_embeds, embed_dim = 16, 128
    narration_embeds = jax.random.normal(k1, (no_embeds, embed_dim), dtype=jnp.float32)
    ids = jax.random.randint(k2, (batch, seq), 0, no_embeds, dtype=jnp.int32)

    model = NarrEmbeddingWrapperPallas(narration_embeds, padding_idx)
    out = model({"language_f": ids})
    language_f = jax.block_until_ready(out["language_f"])
    ref = narration_embeds[ids]
    assert language_f.shape == (batch, seq, embed_dim)
    assert language_f.dtype == narration_embeds.dtype
    assert jnp.allclose(language_f, ref), "one-hot (f32) path mismatch vs reference"

    # --- Path A: bf16 table -> exact single-pass MXU gather ---
    no_embeds_b, embed_dim_b = 64, 128
    table_b = jax.random.normal(k3, (no_embeds_b, embed_dim_b), dtype=jnp.bfloat16)
    ids_b = jax.random.randint(k4, (batch, seq), 0, no_embeds_b, dtype=jnp.int32)
    out_b = jax.block_until_ready(narr_embedding_lookup(ids_b, table_b))
    assert out_b.dtype == jnp.bfloat16
    assert jnp.array_equal(out_b, table_b[ids_b]), "one-hot (bf16) path not bit-exact"

    # --- Path B: large vocab -> scalar-prefetch row gather (non-lane-aligned width) ---
    no_embeds2, embed_dim2 = 4096, 96
    table2 = jax.random.normal(k5, (no_embeds2, embed_dim2), dtype=jnp.float32)
    ids2 = jax.random.randint(k6, (batch, seq), 0, no_embeds2, dtype=jnp.int32)
    out2 = jax.block_until_ready(narr_embedding_lookup(ids2, table2))
    assert out2.shape == (batch, seq, embed_dim2)
    assert out2.dtype == table2.dtype
    assert jnp.array_equal(out2, table2[ids2]), "row-gather path mismatch vs reference"

    print("KERNEL_OK")
</pallas_src>

<mosaic_0001>
module attributes {stable_mosaic.version = 11 : i64} {
  func.func @_embed_onehot_kernel(%arg0: i32, %arg1: memref<1x8x1xi32, #tpu.memory_space<vmem>>, %arg2: memref<16x128xf32, #tpu.memory_space<vmem>>, %arg3: memref<8x128xf32, #tpu.memory_space<vmem>>) attributes {dimension_semantics = [#tpu.dimension_semantics<parallel>], iteration_bounds = array<i64: 2>, scalar_prefetch = 0 : i64, scratch_operands = 0 : i64, tpu.core_type = #tpu.core_type<tc>, window_params = [{transform_indices = @transform_0, window_bounds = array<i64: 1, 8, 1>}, {pipeline_mode = #tpu.pipeline_mode<synchronous>, transform_indices = @transform_1, window_bounds = array<i64: 16, 128>}, {transform_indices = @transform_2, window_bounds = array<i64: 8, 128>}]} {
    %c0 = arith.constant 0 : index
    %c0_0 = arith.constant 0 : index
    %0 = vector.load %arg2[%c0, %c0_0] : memref<16x128xf32, #tpu.memory_space<vmem>>, vector<16x128xf32>
    %c0_1 = arith.constant 0 : index
    %c0_2 = arith.constant 0 : index
    %c0_3 = arith.constant 0 : index
    %1 = vector.load %arg1[%c0_1, %c0_2, %c0_3] : memref<1x8x1xi32, #tpu.memory_space<vmem>>, vector<1x8x1xi32>
    %2 = vector.shape_cast %1 : vector<1x8x1xi32> to vector<8x1xi32>
    %3 = tpu.iota {dimensions = array<i32: 1>} : vector<8x16xi32>
    %4 = vector.broadcast %2 : vector<8x1xi32> to vector<8x16xi32>
    %5 = arith.cmpi eq, %3, %4 : vector<8x16xi32>
    %6 = arith.extui %5 : vector<8x16xi1> to vector<8x16xi32>
    %7 = arith.sitofp %6 : vector<8x16xi32> to vector<8x16xf32>
    %cst = arith.constant dense<0.000000e+00> : vector<8x128xf32>
    %8 = tpu.matmul %7, %0, %cst {dimension_numbers = #tpu.dot_dimension_numbers<[1], [0], [0], [1], [0, 0, 1, 1], [], []>} : vector<8x16xf32>, vector<16x128xf32>, vector<8x128xf32> -> vector<8x128xf32>
    %c0_4 = arith.constant 0 : index
    %c0_5 = arith.constant 0 : index
    %9 = vector.load %arg3[%c0_4, %c0_5] : memref<8x128xf32, #tpu.memory_space<vmem>>, vector<8x128xf32>
    tpu.vector_store %arg3[%c0_4, %c0_5], %8 {strides = array<i32>} : memref<8x128xf32, #tpu.memory_space<vmem>>, vector<8x128xf32>,
    return
  }
  func.func @transform_0(%arg0: i32) -> (i32, i32, i32) {
    %c0_i32 = arith.constant 0 : i32
    %c0_i32_0 = arith.constant 0 : i32
    %c0_i32_1 = arith.constant 0 : i32
    return %arg0, %c0_i32, %c0_i32_0 : i32, i32, i32
  }
  func.func @transform_1(%arg0: i32) -> (i32, i32) {
    %c0_i32 = arith.constant 0 : i32
    %c0_i32_0 = arith.constant 0 : i32
    %c0_i32_1 = arith.constant 0 : i32
    return %c0_i32, %c0_i32_0 : i32, i32
  }
  func.func @transform_2(%arg0: i32) -> (i32, i32) {
    %c0_i32 = arith.constant 0 : i32
    %c0_i32_0 = arith.constant 0 : i32
    return %arg0, %c0_i32 : i32, i32
  }
}

</mosaic_0001>

<bundles_post_ra>
// kernel: tpu_custom_call.1
= control target key start
LH: loop header
LB: loop body
LE: loop exit
PB: predicated region body
PF: predicated region fallthrough
CT: control target
= control target key end

     0   :  { %7 = vsyncpa [#allocation3], 0  ;;  %s557_s0 = inlined_call_operand.vmem [shape: s32[2,8,1], index: 0, kind: input, shape index: {}]   ;;  %s558_s1 = inlined_call_operand.vmem [shape: f32[16,128], index: 1, kind: input, shape index: {}]   ;;  %s559_s2 = inlined_call_operand.hbm [shape: f32[16,128], index: 2, kind: output, shape index: {}]  }
   0x1   :  { %9 = vsyncpa [#allocation3 + $0x1], 0  ;;  %s451_s9 = smov 0   ;;  %s453_s10 = smov 0  }
   0x2   :  { %s455_s11 = smov 0   ;;  %s457_s12 = smov 0  }
   0x3 LB: > { %s472_s13 = sadd.s32 4294967295, %s429_s12   ;;  %s298_s14 = sadd.s32 4294967294, %s429_s12   ;;  %s429_s12 = sphi %s457_s12, %s565_s12   ;;  %s425_s11 = sphi %s455_s11, %s564_s11   ;;  %s421_s10 = sphi %s453_s10, %s563_s10   ;;  %s417_s9 = sphi %s451_s9, %s562_s9  }
   0x4   : > { %s476_s15 = sadd.s32 1, %s429_s12   ;;  %s69_s16 = sadd.s32 1, %s425_s11 }
   0x5   : > { %s66_s17 = ssub.s32 %s429_s12, %s476_s15  ;;  %p79_p0 = scmp.ne.s32.totalorder %s425_s11, %s421_s10 }
   0x6   : > { %p67_p1 = scmp.eq.s32.totalorder %s66_s17, 0  ;;  %p80_p2 = scmp.eq.s32.totalorder %s472_s13, 1 }
   0x7   : > { %p85_p3 = scmp.ne.s32.totalorder %s421_s10, %s417_s9  ;;  %p86_p4 = scmp.eq.s32.totalorder %s298_s14, 1 }
   0x8   : > { %s487_s18 = scalar_select %p67_p1, %s425_s11, %s69_s16  }
   0x9   : > { %p489_p5 = por %p80_p2, %p79_p0  ;;  %p493_p6 = por %p86_p4, %p85_p3 }
   0xa   : > { %p301_p7 = scmp.ge.s32.totalorder %s429_s12, 1  ;;  %p114_p8 = scmp.lt.s32.totalorder %s429_s12, 3 }
   0xc   : > { %p115_p9 = pnand %p301_p7, %p114_p8 }
   0xd   : > { %p135_p10 = scmp.lt.s32.totalorder (!%p115_p9), %s472_s13, 1  ;;  %v139_v0 = vld [vmem:[%s558_s1] sm:$0xff] (!%p115_p9)  ;;  %v140_v1 = vld [vmem:[%s558_s1 + $0x8] sm:$0xff] (!%p115_p9)  ;;  %v431_v2 = vmov (!%p115_p9), 0   ;;  %v432_v3 = vmov (!%p115_p9), 0.0|0.0   ;;  %vm433_vm0 = vmmov (!%p115_p9), 0   ;;  %v142_v7 = vlaneseq (!%p115_p9) }
   0xe   : > { %118 = sbr.rel (%p115_p9) target bundleno = 382 (0x17e), region = 28  ;;  %366 = vset.pattern.permute.xlu0 (!%p115_p9), %v431_v2  ;;  %320 = vmatprep.subr.bf16.mxu0 (!%p115_p9), %v432_v3  ;;  %v321_v4 = vpack.c.bf16 (!%p115_p9), %v140_v1, %v139_v0  ;;  %v434_v6 = vmov (!%p115_p9), 0.0   ;;  %vm150_vm1 = vcmask (!%p115_p9), 130048   ;;  %s132_s30 = sand.u32 (!%p115_p9), 1, %s421_s10  }
   0xf   : > { %317 = vmatprep.mubr.msk.f32.mxu0 (!%p115_p9), %vm433_vm0, %v434_v6  ;;  %v143_v8 = vand.u32 (!%p115_p9), 127, %v142_v7  ;;  %s302_s3 = sshll.u32 (!%p115_p9), %s132_s30, 3  ;;  %s307_s6 = sshll.u32 (!%p115_p9), %s472_s13, 7 }
  0x10   : > { %322 = vmatpush3.bf16.msra.mxu0 (!%p115_p9), %v321_v4  ;;  %s134_s4 = scalar_lea.vmem (!%p115_p9), [#allocation2], %s302_s3  ;;  %s517_s14 = scalar_lea.hbm (!%p115_p9), %s559_s2, %s307_s6 }
  0x11   : > { %s239_s5 = sshll.u32 (!%p115_p9), %s134_s4, 4  ;;  %s226_s16 = scalar_lea.sflag (!%p115_p9), [#allocation3], %s132_s30  ;;  %s512_s5 = int_to_ptr.vmem [resolvable:$true] %s239_s5 }
  0x12   : > { %s367_s17 = scalar_lea.vmem (!%p115_p9), %s512_s5, 128 }
  0x13   : > { %p368_p11 = scmp.ne.s32.totalorder (!%p115_p9), %s512_s5, %s367_s17 }
  0x15   : > { %s136_s25 = scalar_select %p135_p10, %s472_s13, 1 }
  0x16   : > { %p369_p12 = pnand %p368_p11, %p489_p5  ;;  %s435_s13 = smov [#allocation2]  }
  0x17   : > { %s303_s26 = sshll.u32 %s136_s25, 3  ;;  %s371_s21 = sshll.u32 %s435_s13, 4  ;;  %s372_s21 = int_to_ptr.vmem [resolvable:$false] %s371_s21 }
  0x18   : > { %s138_s29 = scalar_lea.vmem %s557_s0, %s303_s26  ;;  %p370_p13 = pneg %p369_p12 }
  0x19   : > { %v141_v5 = vld [vmem:[%s138_s29] sm:$0xff]  ;;  %s373_s22 = scalar_lea.vmem %s372_s21, 256  ;;  %p374_p0 = scmp.lt.s32.totalorder %s512_s5, %s372_s21 }
  0x1a   : > { %145 = vperm.xlu0 %366, %v141_v5   ;;  %p375_p1 = scmp.lt.s32.totalorder %s373_s22, %s367_s17 }
  0x1c   : > { %p376_p2 = por %p375_p1, %p374_p0 }
  0x1e   : > { %p377_p3 = pnand %p376_p2, %p370_p13 }
  0x99   : > { %v146_v9 = vpop.permute.xlu0 %145 }
  0x9a   : > { %vm147_vm2 = vcmp.eq.s32.totalorder %v143_v8, %v146_v9 }
  0x9b   : > { %v304_v10 = vsel %vm147_vm2, 1.0, %v434_v6 }
  0x9c   : > { %318 = vmatmul.mubr.msk.f32.vlgmr.msra.gmra.mrb[0].mxu0 %vm150_vm1, %v304_v10 }
 0x16f   : > { %v220_v11 = vpop.f32.mrb[0].mxu0 }
 0x170   : > { %224 = vst [vmem:[%s134_s4] sm:$0xff] %v220_v11  ;;  %v319_v12 = vpop.f32.mrb[1].mxu0 }
 0x171   : > { %380 = shalt.err (!%p377_p3)
}
 0x172   : > { %s381_s23 = scalar_lea.hbm %s517_s14, 128  ;;  %s385_s26 = scalar_lea.hbm %s559_s2, 256 }
 0x173   : > { %p382_p4 = scmp.ne.s32.totalorder %s517_s14, %s381_s23  ;;  %p386_p9 = scmp.lt.u32.totalorder %s517_s14, %s559_s2 }
 0x174   : > { %p387_p10 = scmp.lt.u32.totalorder %s385_s26, %s381_s23  ;;  %p389_p12 = scmp.lt.u32.totalorder %s381_s23, %s517_s14 }
 0x175   : > { %p383_p7 = pnand %p382_p4, %p489_p5 }
 0x176   : > { %p388_p11 = por %p387_p10, %p386_p9 }
 0x177   : > { %p384_p8 = pneg %p383_p7 }
 0x178   : > { %p390_p13 = por %p389_p12, %p388_p11 }
 0x17a   : > { %p391_p0 = pnand %p390_p13, %p384_p8 }
 0x17c   : > { %394 = shalt.err (!%p391_p0)
}
 0x17d   : > { %323 = dma.vmem_to_hbm [thread:$0]  (%p489_p5), %s512_s5, 128, %s517_s14, %s226_s16  }
 0x17e PF: > { %p329_p1 = scmp.ge.s32.totalorder %s429_s12, 2  ;;  %s251_s29 = sand.u32 1, %s417_s9  }
 0x17f   : > { %s252_s30 = scalar_lea.sflag [#allocation3], %s251_s29 }
 0x180   : > { %p326_p2 = pnand %p329_p1, %p493_p6 }
 0x182   : > { %412 = dma.done.wait (!%p326_p2), %s252_s30, 128  }
 0x183   : > { %414 = vsyncadd (!%p326_p2), %s252_s30, 4294967168  ;;  %p12_p3 = scmp.ge.s32.totalorder %s476_s15, 4   ;;  %s562_s9 = smov %s421_s10 }
 0x184   : > { %s563_s10 = smov %s425_s11  ;;  %s564_s11 = smov %s487_s18 }
 0x185   : > { %s565_s12 = smov %s476_s15  ;;  %14 = sbr.rel (!%p12_p3) target bundleno = 3 (0x3), region = 63 }
 0x18c   :  { %257 = vsyncpa [#allocation3], 1 }
 0x18d   :  { %259 = vsyncpa [#allocation3 + $0x1], 1 }

</bundles_post_ra>
